<compile_context>
chip_gen: v5e
topology: v5e:2x2
jax: 0.10.0
libtpu: 0.0.40
codegen_flags: <defaults>
</compile_context>

<pallas_src>
import functools
import math

import jax
import jax.numpy as jnp
from jax.experimental import pallas as pl
from jax.experimental.pallas import tpu as pltpu


def _pick_tile(dim, target, align):
    """Largest multiple of `align` that divides `dim` and is <= target, else the full dim."""
    t = min(target, dim)
    t = (t // align) * align
    while t > 0:
        if dim % t == 0:
            return t
        t -= align
    return dim


# ---------------------------------------------------------------------------
# Tiled linear: y = x @ w + b
# ---------------------------------------------------------------------------
def _linear_kernel(x_ref, w_ref, b_ref, o_ref, acc_ref):
    @pl.when(pl.program_id(2) == 0)
    def _():
        acc_ref[...] = jnp.zeros_like(acc_ref)

    acc_ref[...] += jnp.dot(x_ref[...], w_ref[...],
                            preferred_element_type=jnp.float32)

    @pl.when(pl.program_id(2) == pl.num_programs(2) - 1)
    def _():
        o_ref[...] = (acc_ref[...] + b_ref[...].astype(jnp.float32)).astype(o_ref.dtype)


def linear(x, w, b, *, tm=256, tn=256, tk=512):
    """x: (M, K), w: (K, N), b: (N,) -> (M, N)."""
    M, K = x.shape
    N = w.shape[1]
    tm = _pick_tile(M, tm, 8)
    tn = _pick_tile(N, tn, 128)
    tk = _pick_tile(K, tk, 128)
    b2 = b.reshape(1, N)
    return pl.pallas_call(
        _linear_kernel,
        out_shape=jax.ShapeDtypeStruct((M, N), x.dtype),
        grid_spec=pltpu.PrefetchScalarGridSpec(
            num_scalar_prefetch=0,
            grid=(M // tm, N // tn, K // tk),
            in_specs=[
                pl.BlockSpec((tm, tk), lambda i, j, k: (i, k)),
                pl.BlockSpec((tk, tn), lambda i, j, k: (k, j)),
                pl.BlockSpec((1, tn), lambda i, j, k: (0, j)),
            ],
            out_specs=pl.BlockSpec((tm, tn), lambda i, j, k: (i, j)),
            scratch_shapes=[pltpu.VMEM((tm, tn), jnp.float32)],
        ),
        compiler_params=pltpu.CompilerParams(
            dimension_semantics=("parallel", "parallel", "arbitrary"),
            vmem_limit_bytes=32 * 1024 * 1024,
        ),
    )(x, w, b2)


# ---------------------------------------------------------------------------
# Flash-style scaled dot-product attention (output only, no attn matrix).
# ---------------------------------------------------------------------------
def _flash_attn_kernel(q_ref, k_ref, v_ref, o_ref, m_ref, l_ref, acc_ref, *, sm_scale):
    ki = pl.program_id(2)

    @pl.when(ki == 0)
    def _():
        m_ref[...] = jnp.full_like(m_ref, -jnp.inf)
        l_ref[...] = jnp.zeros_like(l_ref)
        acc_ref[...] = jnp.zeros_like(acc_ref)

    # Fold 1/sqrt(d_k) into the small Q tile (block_q * d_k mults) instead of
    # dividing the (block_q, block_k) score matrix.
    q = q_ref[0] * sm_scale          # (block_q, d_k)
    k = k_ref[0]                     # (block_k, d_k)
    v = v_ref[0]                     # (block_k, d_k)

    # QK^T as an NT matmul on the MXU: contract the d_k axes directly.
    s = jax.lax.dot_general(q, k, (((1,), (1,)), ((), ())),
                            preferred_element_type=jnp.float32)  # (block_q, block_k)

    m_prev = m_ref[...]
    m_new = jnp.maximum(m_prev, jnp.max(s, axis=-1, keepdims=True))
    alpha = jnp.exp(m_prev - m_new)
    p = jnp.exp(s - m_new)

    l_ref[...] = alpha * l_ref[...] + jnp.sum(p, axis=-1, keepdims=True)
    acc_ref[...] = alpha * acc_ref[...] + jnp.dot(
        p.astype(v.dtype), v, preferred_element_type=jnp.float32)
    m_ref[...] = m_new

    @pl.when(ki == pl.num_programs(2) - 1)
    def _():
        inv_l = pl.reciprocal(l_ref[...], approx=True)   # EUP slot, ~free
        o_ref[0] = (acc_ref[...] * inv_l).astype(o_ref.dtype)


def flash_attention(Q, K, V, *, block_q=256, block_k=512):
    """Q: (B, H, Sq, d_k), K/V: (B, H, Sk, d_k) -> softmax(QK^T/sqrt(d_k)) @ V."""
    B, H, Sq, d_k = Q.shape
    Sk = K.shape[2]
    sm_scale = 1.0 / math.sqrt(d_k)

    BH = B * H
    q3 = Q.reshape(BH, Sq, d_k)
    k3 = K.reshape(BH, Sk, d_k)
    v3 = V.reshape(BH, Sk, d_k)

    block_q = _pick_tile(Sq, block_q, 8)
    block_k = _pick_tile(Sk, block_k, 8)

    kernel = functools.partial(_flash_attn_kernel, sm_scale=sm_scale)

    out3 = pl.pallas_call(
        kernel,
        out_shape=jax.ShapeDtypeStruct((BH, Sq, d_k), Q.dtype),
        grid_spec=pltpu.PrefetchScalarGridSpec(
            num_scalar_prefetch=0,
            grid=(BH, Sq // block_q, Sk // block_k),   # reduction (Sk) axis last
            in_specs=[
                pl.BlockSpec((1, block_q, d_k), lambda b, qi, ki: (b, qi, 0)),
                pl.BlockSpec((1, block_k, d_k), lambda b, qi, ki: (b, ki, 0)),
                pl.BlockSpec((1, block_k, d_k), lambda b, qi, ki: (b, ki, 0)),
            ],
            out_specs=pl.BlockSpec((1, block_q, d_k), lambda b, qi, ki: (b, qi, 0)),
            scratch_shapes=[
                pltpu.VMEM((block_q, 1), jnp.float32),    # running max m
                pltpu.VMEM((block_q, 1), jnp.float32),    # running sum l
                pltpu.VMEM((block_q, d_k), jnp.float32),  # output accumulator
            ],
        ),
        compiler_params=pltpu.CompilerParams(
            dimension_semantics=("parallel", "parallel", "arbitrary"),
            vmem_limit_bytes=32 * 1024 * 1024,
        ),
    )(q3, k3, v3)
    return out3.reshape(B, H, Sq, d_k)


# ---------------------------------------------------------------------------
# MultiHeadAttention forward (eval mode: dropout = identity).
# ---------------------------------------------------------------------------
def multi_head_attention(params, query, key, value):
    H = params["n_heads"]
    B, Sq, d_model = query.shape
    d_k = d_model // H

    def proj(x, w, b):
        Bx, Sx, _ = x.shape
        y = linear(x.reshape(Bx * Sx, d_model), w, b)
        return y.reshape(Bx, Sx, H, d_k).transpose(0, 2, 1, 3)   # (B, H, S, d_k)

    Q = proj(query, params["wq"], params["bq"])
    K = proj(key, params["wk"], params["bk"])
    V = proj(value, params["wv"], params["bv"])

    ctx = flash_attention(Q, K, V)                               # (B, H, Sq, d_k)
    concat = ctx.transpose(0, 2, 1, 3).reshape(B * Sq, H * d_k)  # head concat
    out = linear(concat, params["wo"], params["bo"]).reshape(B, Sq, d_model)
    return out   # dropout: eval-mode identity (see TODO at top)


def _reference_mha(params, query, key, value):
    H = params["n_heads"]
    B, Sq, d_model = query.shape
    Sk = key.shape[1]
    d_k = d_model // H

    def lin(x, w, b):
        return jnp.einsum("bsd,de->bse", x, w) + b

    Q = lin(query, params["wq"], params["bq"]).reshape(B, Sq, H, d_k).transpose(0, 2, 1, 3)
    K = lin(key, params["wk"], params["bk"]).reshape(B, Sk, H, d_k).transpose(0, 2, 1, 3)
    V = lin(value, params["wv"], params["bv"]).reshape(B, Sk, H, d_k).transpose(0, 2, 1, 3)
    scores = jnp.einsum("bhqd,bhkd->bhqk", Q, K) / math.sqrt(d_k)
    attn = jax.nn.softmax(scores, axis=-1)
    ctx = jnp.einsum("bhqk,bhkd->bhqd", attn, V)
    concat = ctx.transpose(0, 2, 1, 3).reshape(B, Sq, d_model)
    return lin(concat, params["wo"], params["bo"])


if __name__ == "__main__":
    B, S, d_model, n_heads = 2, 256, 256, 2   # d_k = 128 -> lane-dense O writeback

    ks = jax.random.split(jax.random.PRNGKey(0), 11)
    w_scale = 1.0 / math.sqrt(d_model)
    params = dict(
        n_heads=n_heads,
        wq=jax.random.normal(ks[0], (d_model, d_model), jnp.float32) * w_scale,
        bq=jax.random.normal(ks[1], (d_model,), jnp.float32) * 0.1,
        wk=jax.random.normal(ks[2], (d_model, d_model), jnp.float32) * w_scale,
        bk=jax.random.normal(ks[3], (d_model,), jnp.float32) * 0.1,
        wv=jax.random.normal(ks[4], (d_model, d_model), jnp.float32) * w_scale,
        bv=jax.random.normal(ks[5], (d_model,), jnp.float32) * 0.1,
        wo=jax.random.normal(ks[6], (d_model, d_model), jnp.float32) * w_scale,
        bo=jax.random.normal(ks[7], (d_model,), jnp.float32) * 0.1,
    )
    query = jax.random.normal(ks[8], (B, S, d_model), jnp.float32)
    key_in = jax.random.normal(ks[9], (B, S, d_model), jnp.float32)
    value = jax.random.normal(ks[10], (B, S, d_model), jnp.float32)

    out = multi_head_attention(params, query, key_in, value)
    jax.block_until_ready(out)

    ref = _reference_mha(params, query, key_in, value)
    err = float(jnp.max(jnp.abs(out - ref)))
    assert out.shape == ref.shape
    assert jnp.allclose(out, ref, atol=5e-3, rtol=5e-3), f"max abs err = {err}"

    print("KERNEL_OK")
</pallas_src>

<mosaic_0001>
module attributes {stable_mosaic.version = 11 : i64} {
  func.func @_linear_kernel(%arg0: i32, %arg1: i32, %arg2: i32, %arg3: memref<256x256xf32, #tpu.memory_space<vmem>>, %arg4: memref<256x256xf32, #tpu.memory_space<vmem>>, %arg5: memref<1x256xf32, #tpu.memory_space<vmem>>, %arg6: memref<256x256xf32, #tpu.memory_space<vmem>>, %arg7: memref<256x256xf32, #tpu.memory_space<vmem>>) attributes {dimension_semantics = [#tpu.dimension_semantics<parallel>, #tpu.dimension_semantics<parallel>, #tpu.dimension_semantics<arbitrary>], iteration_bounds = array<i64: 2, 1, 1>, scalar_prefetch = 0 : i64, scratch_operands = 1 : i64, tpu.core_type = #tpu.core_type<tc>, window_params = [{transform_indices = @transform_0, window_bounds = array<i64: 256, 256>}, {transform_indices = @transform_1, window_bounds = array<i64: 256, 256>}, {transform_indices = @transform_2, window_bounds = array<i64: 1, 256>}, {transform_indices = @transform_3, window_bounds = array<i64: 256, 256>}]} {
    %c0_i32 = arith.constant 0 : i32
    %0 = arith.cmpi eq, %arg2, %c0_i32 : i32
    %1 = arith.extui %0 : i1 to i32
    %c0_i32_0 = arith.constant 0 : i32
    %2 = arith.cmpi ne, %1, %c0_i32_0 : i32
    scf.if %2 {
      %cst_10 = arith.constant 0.000000e+00 : f32
      %12 = vector.broadcast %cst_10 : f32 to vector<256x256xf32>
      %c0_11 = arith.constant 0 : index
      %c0_12 = arith.constant 0 : index
      %13 = vector.load %arg7[%c0_11, %c0_12] : memref<256x256xf32, #tpu.memory_space<vmem>>, vector<256x256xf32>
      tpu.vector_store %arg7[%c0_11, %c0_12], %12 {strides = array<i32>} : memref<256x256xf32, #tpu.memory_space<vmem>>, vector<256x256xf32>,
    } else {
    }
    %c0 = arith.constant 0 : index
    %c0_1 = arith.constant 0 : index
    %3 = vector.load %arg7[%c0, %c0_1] : memref<256x256xf32, #tpu.memory_space<vmem>>, vector<256x256xf32>
    %c0_2 = arith.constant 0 : index
    %c0_3 = arith.constant 0 : index
    %4 = vector.load %arg3[%c0_2, %c0_3] : memref<256x256xf32, #tpu.memory_space<vmem>>, vector<256x256xf32>
    %c0_4 = arith.constant 0 : index
    %c0_5 = arith.constant 0 : index
    %5 = vector.load %arg4[%c0_4, %c0_5] : memref<256x256xf32, #tpu.memory_space<vmem>>, vector<256x256xf32>
    %cst = arith.constant dense<0.000000e+00> : vector<256x256xf32>
    %6 = tpu.matmul %4, %5, %cst {dimension_numbers = #tpu.dot_dimension_numbers<[1], [0], [0], [1], [0, 0, 1, 1], [], []>} : vector<256x256xf32>, vector<256x256xf32>, vector<256x256xf32> -> vector<256x256xf32>
    %7 = arith.addf %3, %6 : vector<256x256xf32>
    %c0_6 = arith.constant 0 : index
    %c0_7 = arith.constant 0 : index
    %8 = vector.load %arg7[%c0_6, %c0_7] : memref<256x256xf32, #tpu.memory_space<vmem>>, vector<256x256xf32>
    tpu.vector_store %arg7[%c0_6, %c0_7], %7 {strides = array<i32>} : memref<256x256xf32, #tpu.memory_space<vmem>>, vector<256x256xf32>,
    %c0_i32_8 = arith.constant 0 : i32
    %9 = arith.cmpi eq, %arg2, %c0_i32_8 : i32
    %10 = arith.extui %9 : i1 to i32
    %c0_i32_9 = arith.constant 0 : i32
    %11 = arith.cmpi ne, %10, %c0_i32_9 : i32
    scf.if %11 {
      %c0_10 = arith.constant 0 : index
      %c0_11 = arith.constant 0 : index
      %12 = vector.load %arg7[%c0_10, %c0_11] : memref<256x256xf32, #tpu.memory_space<vmem>>, vector<256x256xf32>
      %c0_12 = arith.constant 0 : index
      %c0_13 = arith.constant 0 : index
      %13 = vector.load %arg5[%c0_12, %c0_13] : memref<1x256xf32, #tpu.memory_space<vmem>>, vector<1x256xf32>
      %14 = vector.broadcast %13 : vector<1x256xf32> to vector<256x256xf32>
      %15 = arith.addf %12, %14 : vector<256x256xf32>
      %c0_14 = arith.constant 0 : index
      %c0_15 = arith.constant 0 : index
      %16 = vector.load %arg6[%c0_14, %c0_15] : memref<256x256xf32, #tpu.memory_space<vmem>>, vector<256x256xf32>
      tpu.vector_store %arg6[%c0_14, %c0_15], %15 {strides = array<i32>} : memref<256x256xf32, #tpu.memory_space<vmem>>, vector<256x256xf32>,
    } else {
    }
    return
  }
  func.func @transform_0(%arg0: i32, %arg1: i32, %arg2: i32) -> (i32, i32) {
    %c0_i32 = arith.constant 0 : i32
    return %arg0, %arg2 : i32, i32
  }
  func.func @transform_1(%arg0: i32, %arg1: i32, %arg2: i32) -> (i32, i32) {
    %c0_i32 = arith.constant 0 : i32
    return %arg2, %arg1 : i32, i32
  }
  func.func @transform_2(%arg0: i32, %arg1: i32, %arg2: i32) -> (i32, i32) {
    %c0_i32 = arith.constant 0 : i32
    %c0_i32_0 = arith.constant 0 : i32
    return %c0_i32, %arg1 : i32, i32
  }
  func.func @transform_3(%arg0: i32, %arg1: i32, %arg2: i32) -> (i32, i32) {
    %c0_i32 = arith.constant 0 : i32
    return %arg0, %arg1 : i32, i32
  }
}

</mosaic_0001>

<bundles_post_ra>
// kernel: tpu_custom_call.1
= control target key start
LH: loop header
LB: loop body
LE: loop exit
PB: predicated region body
PF: predicated region fallthrough
CT: control target
= control target key end

     0   :  { %8 = vsyncpa [#allocation4], 0  ;;  %s2120_s0 = inlined_call_operand.hbm [shape: f32[512,256], index: 0, kind: input, shape index: {}]   ;;  %s2121_s1 = inlined_call_operand.hbm [shape: f32[256,256], index: 1, kind: input, shape index: {}]   ;;  %s2122_s2 = inlined_call_operand.hbm [shape: f32[1,256], index: 2, kind: input, shape index: {}]   ;;  %s2123_s3 = inlined_call_operand.hbm [shape: f32[512,256], index: 3, kind: output, shape index: {}]  }
   0x1   :  { %10 = vsyncpa [#allocation4 + $0x1], 0 }
   0x2   :  { %11 = vsyncpa [#allocation7], 0 }
   0x3   :  { %12 = vsyncpa [#allocation5], 0 }
   0x4   :  { %14 = vsyncpa [#allocation5 + $0x1], 0  ;;  %s1767_s12 = smov 0   ;;  %s1769_s13 = smov 0  }
   0x5   :  { %s1771_s14 = smov 0   ;;  %s1773_s15 = smov 0  }
   0x6   :  { %s1775_s16 = smov 0   ;;  %s1777_s17 = smov 0  }
   0x7 LB: > { %s1451_s18 = sadd.s32 4294967295, %s1739_s17   ;;  %s1452_s19 = sadd.s32 4294967294, %s1739_s17   ;;  %s1739_s17 = sphi %s1777_s17, %s20_s17   ;;  %s1735_s16 = sphi %s1775_s16, %s2133_s16   ;;  %s1731_s15 = sphi %s1773_s15, %s2132_s15   ;;  %s1727_s14 = sphi %s1771_s14, %s2131_s14   ;;  %s1723_s13 = sphi %s1769_s13, %s2130_s13   ;;  %s1719_s12 = sphi %s1767_s12, %s2129_s12  }
   0x8   : > { %p61_p0 = scmp.ne.s32.totalorder %s1723_s13, %s1719_s12  ;;  %p1801_p1 = scmp.eq.s32.totalorder %s1451_s18, 0 }
   0x9   : > { %p147_p2 = scmp.eq.s32.totalorder %s1452_s19, 1  ;;  %p1453_p4 = scmp.ge.s32.totalorder %s1739_s17, 1 }
   0xa   : > { %p1807_p3 = por %p1801_p1, %p61_p0  ;;  %p154_p6 = scmp.lt.s32.totalorder %s1739_s17, 3 }
   0xb   : > { %p1812_p5 = por %p147_p2, %p61_p0  ;;  %s171_s25 = sshll.u32 %s2121_s1, 4  ;;  %s172_s25 = int_to_ptr.hbm [resolvable:$true] %s171_s25 }
   0xc   : > { %p1820_p7 = pnand %p1453_p4, %p154_p6  ;;  %s1741_s27 = smov [#allocation6]  }
   0xd   : > { %s173_s28 = sshll.u32 %s1741_s27, 4  ;;  %p1456_p10 = scmp.ge.s32.totalorder %s1739_s17, 2  ;;  %s174_s28 = int_to_ptr.vmem [resolvable:$true] %s173_s28 }
   0xe   : > { %p1488_p8 = pneg %p1820_p7  ;;  %s188_s4 = sshll.u32 %s2122_s2, 4  ;;  %s189_s4 = int_to_ptr.hbm [resolvable:$true] %s188_s4 }
   0xf   : > { %s1742_s5 = smov 256   ;;  %s1743_s6 = smov 16  }
  0x10   : > { %p1489_p9 = pnand %p1488_p8, %p1801_p1  ;;  %s1744_s7 = smov [#allocation8]  }
  0x11   : > { %s190_s8 = sshll.u32 %s1744_s7, 4  ;;  %p141_p11 = scmp.eq.s32.totalorder %s1451_s18, 1  ;;  %s191_s8 = int_to_ptr.vmem [resolvable:$true] %s190_s8 }
  0x12   : > { %1491 = dma.hbm_to_vmem [thread:$0]  (!%p1489_p9), %s172_s25, 8192, %s174_s28, [#allocation7], %s1742_s5, %s1742_s5, %s1743_s6  }
  0x13   : > { %1494 = dma.hbm_to_vmem [thread:$0]  (!%p1489_p9), %s189_s4, 32, %s191_s8, [#allocation7]  }
  0x14   : > { %s39_s9 = sadd.s32 1, %s1735_s16  ;;  %s48_s10 = sadd.s32 1, %s1727_s14 }
  0x15   : > { %p41_p12 = scmp.ge.s32.totalorder %s39_s9, 2  ;;  %p55_p13 = scmp.ne.s32.totalorder %s1727_s14, %s1723_s13 }
  0x16   : > { %p56_p0 = scmp.eq.s32.totalorder %s1739_s17, 0  ;;  %p1505_p4 = scmp.lt.s32.totalorder %s1739_s17, 2 }
  0x17   : > { %s2135_s9 = smov (%p41_p12, %s39_s9), 0  ;;  %p1842_p2 = por %p141_p11, %p55_p13 }
  0x18   : > { %s43_s19 = ssub.s32 %s1735_s16, %s2135_s9  ;;  %s201_s23 = sand.u32 1, %s1727_s14  }
  0x19   : > { %p46_p6 = scmp.eq.s32.totalorder %s43_s19, 0  ;;  %p57_p8 = por %p56_p0, %p55_p13 }
  0x1a   : > { %s1457_s24 = sshll.u32 %s201_s23, 9  ;;  %s1473_s18 = sshll.u32 %s1735_s16, 9 }
  0x1b   : > { %s1852_s25 = scalar_select %p46_p6, %s1727_s14, %s48_s10  }
  0x1c   : > { %s213_s29 = scalar_lea.hbm %s2120_s0, %s1473_s18  ;;  %s205_s4 = scalar_lea.vmem [#allocation3], %s1457_s24 }
  0x1d   : > { %s214_s30 = sshll.u32 %s213_s29, 4  ;;  %s216_s7 = sshll.u32 %s205_s4, 4  ;;  %s215_s30 = int_to_ptr.hbm [resolvable:$true] %s214_s30  ;;  %s217_s7 = int_to_ptr.vmem [resolvable:$true] %s216_s7 }
  0x1e   : > { %p1496_p9 = pnand %p1505_p4, %p57_p8  ;;  %s202_s8 = scalar_lea.sflag [#allocation4], %s201_s23 }
  0x1f   : > { %228 = sbr.rel (%p1820_p7) target bundleno = 460 (0x1cc), region = 32  ;;  %s1865_s10 = sand.u32 (!%p1820_p7), 1, %s1723_s13  }
  0x20   : > { %1498 = dma.hbm_to_vmem [thread:$0]  (!%p1496_p9), %s215_s30, 8192, %s217_s7, %s202_s8, %s1742_s5, %s1742_s5, %s1743_s6  }
  0x21   : > { %s1462_s19 = sshll.u32 (!%p1820_p7), %s1865_s10, 9  ;;  %s231_s24 = scalar_lea.sflag (!%p1820_p7), [#allocation4], %s1865_s10 }
  0x22   : > { %s1871_s18 = scalar_lea.vmem (!%p1820_p7), [#allocation3], %s1462_s19 }
  0x24   : > { %1706 = dma.done.wait (%p1807_p3), %s231_s24, 8192  }
  0x25   : > { %1708 = vsyncadd (%p1807_p3), %s231_s24, 4294959104 }
  0x26   : > { %1710 = dma.done.wait (%p1801_p1), [#allocation7], 8224  }
  0x27   : > { %1712 = vsyncadd (%p1801_p1), [#allocation7], 4294959072  ;;  %v502_v0 = vld [vmem:[#allocation6 + $0xf8] sm:$0xff]  ;;  %v500_v2 = vld [vmem:[#allocation6 + $0xe8] sm:$0xff]  ;;  %s1924_s20 = scalar_lea.vmem [#allocation9], %s1462_s19  ;;  %s1475_s21 = sshll.u32 %s1731_s15, 9 }
  0x28   : > { %v534_v1 = vld [vmem:[#allocation6 + $0x1f8] sm:$0xff]  ;;  %761 = vmatpush.msra.mxu2 %v502_v0  ;;  %v532_v3 = vld [vmem:[#allocation6 + $0x1e8] sm:$0xff]  ;;  %v501_v6 = vld [vmem:[#allocation6 + $0xf0] sm:$0xff]  ;;  %s1331_s6 = scalar_lea.hbm %s2123_s3, %s1475_s21  ;;  %s1332_s23 = sshll.u32 %s1924_s20, 4  ;;  %s1333_s23 = int_to_ptr.vmem [resolvable:$true] %s1332_s23 }
  0x29   : > { %874 = vmatpush.msra.mxu3 %v534_v1  ;;  %v498_v4 = vld [vmem:[#allocation6 + $0xd8] sm:$0xff]  ;;  %v533_v7 = vld [vmem:[#allocation6 + $0x1f0] sm:$0xff]  ;;  %v499_v8 = vld [vmem:[#allocation6 + $0xe0] sm:$0xff]  ;;  %535 = vmatpush.msra.mxu0 %v501_v6  ;;  %s1334_s27 = sshll.u32 %s1331_s6, 4  ;;  %s1317_s15 = scalar_lea.sflag [#allocation5], %s1865_s10  ;;  %s1335_s27 = int_to_ptr.hbm [resolvable:$true] %s1334_s27 }
  0x2a   : > { %v530_v5 = vld [vmem:[#allocation6 + $0x1d8] sm:$0xff]  ;;  %762 = vmatpush.msra.mxu2 %v500_v2  ;;  %v531_v9 = vld [vmem:[#allocation6 + $0x1e0] sm:$0xff]  ;;  %648 = vmatpush.msra.mxu1 %v533_v7  ;;  %v496_v10 = vld [vmem:[#allocation6 + $0xc8] sm:$0xff]  ;;  %s1667_s28 = sshra.s32 %s1335_s27, 4  ;;  %s1673_s7 = scalar_lea.hbm %s2123_s3, 1024  ;;  %s1668_s28 = int_to_ptr.hbm [resolvable:$true] %s1667_s28 }
  0x2b   : > { %875 = vmatpush.msra.mxu3 %v532_v3  ;;  %v528_v11 = vld [vmem:[#allocation6 + $0x1c8] sm:$0xff]  ;;  %v497_v12 = vld [vmem:[#allocation6 + $0xd0] sm:$0xff]  ;;  %536 = vmatpush.msra.mxu0 %v499_v8  ;;  %v494_v14 = vld [vmem:[#allocation6 + $0xb8] sm:$0xff]  ;;  %s1669_s29 = scalar_lea.hbm %s1668_s28, 512  ;;  %p1674_p11 = scmp.lt.s32.totalorder %s1668_s28, %s2123_s3 }
  0x2c   : > { %763 = vmatpush.msra.mxu2 %v498_v4  ;;  %v529_v13 = vld [vmem:[#allocation6 + $0x1d0] sm:$0xff]  ;;  %649 = vmatpush.msra.mxu1 %v531_v9  ;;  %v526_v15 = vld [vmem:[#allocation6 + $0x1b8] sm:$0xff]  ;;  %v495_v16 = vld [vmem:[#allocation6 + $0xc0] sm:$0xff]  ;;  %p1670_p1 = scmp.ne.s32.totalorder %s1668_s28, %s1669_s29  ;;  %p1675_p12 = scmp.lt.s32.totalorder %s1673_s7, %s1669_s29 }
  0x2d   : > { %876 = vmatpush.msra.mxu3 %v530_v5  ;;  %v527_v17 = vld [vmem:[#allocation6 + $0x1c0] sm:$0xff]  ;;  %537 = vmatpush.msra.mxu0 %v497_v12  ;;  %v492_v18 = vld [vmem:[#allocation6 + $0xa8] sm:$0xff]  ;;  %v493_v20 = vld [vmem:[#allocation6 + $0xb0] sm:$0xff] }
  0x2e   : > { %764 = vmatpush.msra.mxu2 %v496_v10  ;;  %650 = vmatpush.msra.mxu1 %v529_v13  ;;  %v524_v19 = vld [vmem:[#allocation6 + $0x1a8] sm:$0xff]  ;;  %v525_v21 = vld [vmem:[#allocation6 + $0x1b0] sm:$0xff]  ;;  %v490_v22 = vld [vmem:[#allocation6 + $0x98] sm:$0xff]  ;;  %p1671_p3 = pnand %p1670_p1, %p1842_p2  ;;  %p1676_p13 = por %p1675_p12, %p1674_p11 }
  0x2f   : > { %877 = vmatpush.msra.mxu3 %v528_v11  ;;  %538 = vmatpush.msra.mxu0 %v495_v16  ;;  %v522_v23 = vld [vmem:[#allocation6 + $0x198] sm:$0xff]  ;;  %v491_v24 = vld [vmem:[#allocation6 + $0xa0] sm:$0xff]  ;;  %v488_v26 = vld [vmem:[#allocation6 + $0x88] sm:$0xff] }
  0x30   : > { %765 = vmatpush.msra.mxu2 %v494_v14  ;;  %651 = vmatpush.msra.mxu1 %v527_v17  ;;  %v523_v25 = vld [vmem:[#allocation6 + $0x1a0] sm:$0xff]  ;;  %v520_v27 = vld [vmem:[#allocation6 + $0x188] sm:$0xff]  ;;  %v489_v28 = vld [vmem:[#allocation6 + $0x90] sm:$0xff]  ;;  %p1672_p7 = pneg %p1671_p3 }
  0x31   : > { %878 = vmatpush.msra.mxu3 %v526_v15  ;;  %539 = vmatpush.msra.mxu0 %v493_v20  ;;  %v521_v29 = vld [vmem:[#allocation6 + $0x190] sm:$0xff]  ;;  %v486_v30 = vld [vmem:[#allocation6 + $0x78] sm:$0xff]  ;;  %v487_v32 = vld [vmem:[#allocation6 + $0x80] sm:$0xff] }
  0x32   : > { %766 = vmatpush.msra.mxu2 %v492_v18  ;;  %652 = vmatpush.msra.mxu1 %v525_v21  ;;  %v518_v31 = vld [vmem:[#allocation6 + $0x178] sm:$0xff]  ;;  %v519_v33 = vld [vmem:[#allocation6 + $0x180] sm:$0xff]  ;;  %v484_v34 = vld [vmem:[#allocation6 + $0x68] sm:$0xff]  ;;  %p1677_p0 = pnand %p1676_p13, %p1672_p7 }
  0x33   : > { %879 = vmatpush.msra.mxu3 %v524_v19  ;;  %540 = vmatpush.msra.mxu0 %v491_v24  ;;  %v516_v35 = vld [vmem:[#allocation6 + $0x168] sm:$0xff]  ;;  %v485_v36 = vld [vmem:[#allocation6 + $0x70] sm:$0xff]  ;;  %v482_v38 = vld [vmem:[#allocation6 + $0x58] sm:$0xff] }
  0x34   : > { %767 = vmatpush.msra.mxu2 %v490_v22  ;;  %653 = vmatpush.msra.mxu1 %v523_v25  ;;  %v517_v37 = vld [vmem:[#allocation6 + $0x170] sm:$0xff]  ;;  %v514_v39 = vld [vmem:[#allocation6 + $0x158] sm:$0xff]  ;;  %v483_v40 = vld [vmem:[#allocation6 + $0x60] sm:$0xff] }
  0x35   : > { %880 = vmatpush.msra.mxu3 %v522_v23  ;;  %541 = vmatpush.msra.mxu0 %v489_v28  ;;  %v515_v41 = vld [vmem:[#allocation6 + $0x160] sm:$0xff]  ;;  %v480_v42 = vld [vmem:[#allocation6 + $0x48] sm:$0xff]  ;;  %v481_v44 = vld [vmem:[#allocation6 + $0x50] sm:$0xff] }
  0x36   : > { %768 = vmatpush.msra.mxu2 %v488_v26  ;;  %654 = vmatpush.msra.mxu1 %v521_v29  ;;  %v512_v43 = vld [vmem:[#allocation6 + $0x148] sm:$0xff]  ;;  %v513_v45 = vld [vmem:[#allocation6 + $0x150] sm:$0xff]  ;;  %v478_v46 = vld [vmem:[#allocation6 + $0x38] sm:$0xff] }
  0x37   : > { %881 = vmatpush.msra.mxu3 %v520_v27  ;;  %542 = vmatpush.msra.mxu0 %v487_v32  ;;  %v510_v47 = vld [vmem:[#allocation6 + $0x138] sm:$0xff]  ;;  %v479_v48 = vld [vmem:[#allocation6 + $0x40] sm:$0xff]  ;;  %v476_v50 = vld [vmem:[#allocation6 + $0x28] sm:$0xff] }
  0x38   : > { %769 = vmatpush.msra.mxu2 %v486_v30  ;;  %655 = vmatpush.msra.mxu1 %v519_v33  ;;  %v511_v49 = vld [vmem:[#allocation6 + $0x140] sm:$0xff]  ;;  %v508_v51 = vld [vmem:[#allocation6 + $0x128] sm:$0xff]  ;;  %v477_v52 = vld [vmem:[#allocation6 + $0x30] sm:$0xff] }
  0x39   : > { %882 = vmatpush.msra.mxu3 %v518_v31  ;;  %543 = vmatpush.msra.mxu0 %v485_v36  ;;  %v509_v53 = vld [vmem:[#allocation6 + $0x130] sm:$0xff]  ;;  %v474_v54 = vld [vmem:[#allocation6 + $0x18] sm:$0xff]  ;;  %v475_v56 = vld [vmem:[#allocation6 + $0x20] sm:$0xff] }
  0x3a   : > { %770 = vmatpush.msra.mxu2 %v484_v34  ;;  %656 = vmatpush.msra.mxu1 %v517_v37  ;;  %v506_v55 = vld [vmem:[#allocation6 + $0x118] sm:$0xff]  ;;  %v507_v57 = vld [vmem:[#allocation6 + $0x120] sm:$0xff]  ;;  %v472_v58 = vld [vmem:[#allocation6 + $0x8] sm:$0xff] }
  0x3b   : > { %883 = vmatpush.msra.mxu3 %v516_v35  ;;  %544 = vmatpush.msra.mxu0 %v483_v40  ;;  %v504_v59 = vld [vmem:[#allocation6 + $0x108] sm:$0xff]  ;;  %v407_v60 = vld [vmem:[%s1871_s18] sm:$0xff]  ;;  %v473_v62 = vld [vmem:[#allocation6 + $0x10] sm:$0xff] }
  0x3c   : > { %771 = vmatpush.msra.mxu2 %v482_v38  ;;  %657 = vmatpush.msra.mxu1 %v515_v41  ;;  %v408_v61 = vld [vmem:[%s1871_s18 + $0x8] sm:$0xff]  ;;  %v505_v63 = vld [vmem:[#allocation6 + $0x110] sm:$0xff]  ;;  %v471_v0 = vld [vmem:[#allocation6] sm:$0xff] }
  0x3d   : > { %884 = vmatpush.msra.mxu3 %v514_v39  ;;  %545 = vmatpush.msra.mxu0 %v481_v44  ;;  %v503_v1 = vld [vmem:[#allocation6 + $0x100] sm:$0xff]  ;;  %v409_v2 = vld [vmem:[%s1871_s18 + $0x10] sm:$0xff]  ;;  %v410_v3 = vld [vmem:[%s1871_s18 + $0x18] sm:$0xff] }
  0x3e   : > { %772 = vmatpush.msra.mxu2 %v480_v42  ;;  %658 = vmatpush.msra.mxu1 %v513_v45  ;;  %v411_v4 = vld [vmem:[%s1871_s18 + $0x20] sm:$0xff]  ;;  %v412_v5 = vld [vmem:[%s1871_s18 + $0x28] sm:$0xff]  ;;  %v413_v6 = vld [vmem:[%s1871_s18 + $0x30] sm:$0xff] }
  0x3f   : > { %885 = vmatpush.msra.mxu3 %v512_v43  ;;  %546 = vmatpush.msra.mxu0 %v479_v48  ;;  %v414_v7 = vld [vmem:[%s1871_s18 + $0x38] sm:$0xff]  ;;  %v415_v8 = vld [vmem:[%s1871_s18 + $0x40] sm:$0xff]  ;;  %v416_v9 = vld [vmem:[%s1871_s18 + $0x48] sm:$0xff] }
  0x40   : > { %773 = vmatpush.msra.mxu2 %v478_v46  ;;  %659 = vmatpush.msra.mxu1 %v511_v49  ;;  %v417_v10 = vld [vmem:[%s1871_s18 + $0x50] sm:$0xff]  ;;  %v418_v11 = vld [vmem:[%s1871_s18 + $0x58] sm:$0xff]  ;;  %v419_v12 = vld [vmem:[%s1871_s18 + $0x60] sm:$0xff] }
  0x41   : > { %886 = vmatpush.msra.mxu3 %v510_v47  ;;  %547 = vmatpush.msra.mxu0 %v477_v52  ;;  %v420_v13 = vld [vmem:[%s1871_s18 + $0x68] sm:$0xff]  ;;  %v421_v14 = vld [vmem:[%s1871_s18 + $0x70] sm:$0xff]  ;;  %v422_v15 = vld [vmem:[%s1871_s18 + $0x78] sm:$0xff] }
  0x42   : > { %774 = vmatpush.msra.mxu2 %v476_v50  ;;  %660 = vmatpush.msra.mxu1 %v509_v53  ;;  %v423_v16 = vld [vmem:[%s1871_s18 + $0x80] sm:$0xff]  ;;  %v424_v17 = vld [vmem:[%s1871_s18 + $0x88] sm:$0xff]  ;;  %v425_v18 = vld [vmem:[%s1871_s18 + $0x90] sm:$0xff] }
  0x43   : > { %887 = vmatpush.msra.mxu3 %v508_v51  ;;  %548 = vmatpush.msra.mxu0 %v475_v56  ;;  %v426_v19 = vld [vmem:[%s1871_s18 + $0x98] sm:$0xff]  ;;  %v427_v20 = vld [vmem:[%s1871_s18 + $0xa0] sm:$0xff]  ;;  %v428_v21 = vld [vmem:[%s1871_s18 + $0xa8] sm:$0xff] }
  0x44   : > { %775 = vmatpush.msra.mxu2 %v474_v54  ;;  %661 = vmatpush.msra.mxu1 %v507_v57  ;;  %v429_v22 = vld [vmem:[%s1871_s18 + $0xb0] sm:$0xff]  ;;  %v430_v23 = vld [vmem:[%s1871_s18 + $0xb8] sm:$0xff]  ;;  %v431_v24 = vld [vmem:[%s1871_s18 + $0xc0] sm:$0xff] }
  0x45   : > { %888 = vmatpush.msra.mxu3 %v506_v55  ;;  %549 = vmatpush.msra.mxu0 %v473_v62  ;;  %v432_v25 = vld [vmem:[%s1871_s18 + $0xc8] sm:$0xff]  ;;  %v433_v26 = vld [vmem:[%s1871_s18 + $0xd0] sm:$0xff]  ;;  %v434_v27 = vld [vmem:[%s1871_s18 + $0xd8] sm:$0xff] }
  0x46   : > { %776 = vmatpush.msra.mxu2 %v472_v58  ;;  %662 = vmatpush.msra.mxu1 %v505_v63  ;;  %v435_v28 = vld [vmem:[%s1871_s18 + $0xe0] sm:$0xff]  ;;  %v436_v29 = vld [vmem:[%s1871_s18 + $0xe8] sm:$0xff]  ;;  %v437_v30 = vld [vmem:[%s1871_s18 + $0xf0] sm:$0xff] }
  0x47   : > { %889 = vmatpush.msra.mxu3 %v504_v59  ;;  %777 = vmatmul.f32.vlgmr.msra.gmra.mxu2 %v407_v60  ;;  %v438_v31 = vld [vmem:[%s1871_s18 + $0xf8] sm:$0xff]  ;;  %v439_v32 = vld [vmem:[%s1871_s18 + $0x100] sm:$0xff]  ;;  %v440_v33 = vld [vmem:[%s1871_s18 + $0x108] sm:$0xff] }
  0x48   : > { %890 = vmatmul.f32.vlgmr.msra.gmra.mxu3 %v408_v61  ;;  %550 = vmatpush.msra.mxu0 %v471_v0  ;;  %v1182_v34 = vld [vmem:[#allocation8] sm:$0x3]  ;;  %v441_v44 = vld [vmem:[%s1871_s18 + $0x110] sm:$0xff]  ;;  %v442_v45 = vld [vmem:[%s1871_s18 + $0x118] sm:$0xff] }
  0x49   : > { %663 = vmatpush.msra.mxu1 %v503_v1  ;;  %551 = vmatmul.f32.vlgmr.msra.gmra.mxu0 %v407_v60  ;;  %v1915_v35 = vperm.slane %v1182_v34, 0  ;;  %v1917_v39 = vperm.slane %v1182_v34, 1  ;;  %v443_v54 = vld [vmem:[%s1871_s18 + $0x120] sm:$0xff]  ;;  %v444_v55 = vld [vmem:[%s1871_s18 + $0x128] sm:$0xff]  ;;  %v445_v0 = vld [vmem:[%s1871_s18 + $0x130] sm:$0xff] }
  0x4a   : > { %664 = vmatmul.f32.vlgmr.msra.gmra.mxu1 %v408_v61  ;;  %v446_v1 = vld [vmem:[%s1871_s18 + $0x138] sm:$0xff] }
  0x4f   : > { %780 = vmatmul.f32.gmra.mxu2 %v409_v2 }
  0x50   : > { %893 = vmatmul.f32.gmra.mxu3 %v410_v3 }
  0x51   : > { %554 = vmatmul.f32.gmra.mxu0 %v409_v2 }
  0x52   : > { %667 = vmatmul.f32.gmra.mxu1 %v410_v3 }
  0x57   : > { %783 = vmatmul.f32.gmra.mxu2 %v411_v4 }
  0x58   : > { %896 = vmatmul.f32.gmra.mxu3 %v412_v5 }
  0x59   : > { %557 = vmatmul.f32.gmra.mxu0 %v411_v4 }
  0x5a   : > { %670 = vmatmul.f32.gmra.mxu1 %v412_v5 }
  0x5f   : > { %786 = vmatmul.f32.gmra.mxu2 %v413_v6 }
  0x60   : > { %899 = vmatmul.f32.gmra.mxu3 %v414_v7 }
  0x61   : > { %560 = vmatmul.f32.gmra.mxu0 %v413_v6 }
  0x62   : > { %673 = vmatmul.f32.gmra.mxu1 %v414_v7 }
  0x67   : > { %789 = vmatmul.f32.gmra.mxu2 %v415_v8 }
  0x68   : > { %902 = vmatmul.f32.gmra.mxu3 %v416_v9 }
  0x69   : > { %563 = vmatmul.f32.gmra.mxu0 %v415_v8 }
  0x6a   : > { %676 = vmatmul.f32.gmra.mxu1 %v416_v9 }
  0x6f   : > { %792 = vmatmul.f32.gmra.mxu2 %v417_v10 }
  0x70   : > { %905 = vmatmul.f32.gmra.mxu3 %v418_v11 }
  0x71   : > { %566 = vmatmul.f32.gmra.mxu0 %v417_v10  ;;  %v447_v10 = vld [vmem:[%s1871_s18 + $0x140] sm:$0xff] }
  0x72   : > { %679 = vmatmul.f32.gmra.mxu1 %v418_v11  ;;  %v448_v11 = vld [vmem:[%s1871_s18 + $0x148] sm:$0xff] }
  0x77   : > { %795 = vmatmul.f32.gmra.mxu2 %v419_v12 }
  0x78   : > { %908 = vmatmul.f32.gmra.mxu3 %v420_v13 }
  0x79   : > { %569 = vmatmul.f32.gmra.mxu0 %v419_v12 }
  0x7a   : > { %682 = vmatmul.f32.gmra.mxu1 %v420_v13 }
  0x7f   : > { %798 = vmatmul.f32.gmra.mxu2 %v421_v14 }
  0x80   : > { %911 = vmatmul.f32.gmra.mxu3 %v422_v15 }
  0x81   : > { %572 = vmatmul.f32.gmra.mxu0 %v421_v14 }
  0x82   : > { %685 = vmatmul.f32.gmra.mxu1 %v422_v15 }
  0x87   : > { %801 = vmatmul.f32.gmra.mxu2 %v423_v16 }
  0x88   : > { %914 = vmatmul.f32.gmra.mxu3 %v424_v17 }
  0x89   : > { %575 = vmatmul.f32.gmra.mxu0 %v423_v16 }
  0x8a   : > { %688 = vmatmul.f32.gmra.mxu1 %v424_v17 }
  0x8f   : > { %804 = vmatmul.f32.gmra.mxu2 %v425_v18 }
  0x90   : > { %917 = vmatmul.f32.gmra.mxu3 %v426_v19 }
  0x91   : > { %578 = vmatmul.f32.gmra.mxu0 %v425_v18 }
  0x92   : > { %691 = vmatmul.f32.gmra.mxu1 %v426_v19 }
  0x97   : > { %807 = vmatmul.f32.gmra.mxu2 %v427_v20 }
  0x98   : > { %920 = vmatmul.f32.gmra.mxu3 %v428_v21 }
  0x99   : > { %581 = vmatmul.f32.gmra.mxu0 %v427_v20  ;;  %v449_v20 = vld [vmem:[%s1871_s18 + $0x150] sm:$0xff] }
  0x9a   : > { %694 = vmatmul.f32.gmra.mxu1 %v428_v21  ;;  %v450_v21 = vld [vmem:[%s1871_s18 + $0x158] sm:$0xff] }
  0x9f   : > { %810 = vmatmul.f32.gmra.mxu2 %v429_v22 }
  0xa0   : > { %923 = vmatmul.f32.gmra.mxu3 %v430_v23 }
  0xa1   : > { %584 = vmatmul.f32.gmra.mxu0 %v429_v22 }
  0xa2   : > { %697 = vmatmul.f32.gmra.mxu1 %v430_v23 }
  0xa7   : > { %813 = vmatmul.f32.gmra.mxu2 %v431_v24 }
  0xa8   : > { %926 = vmatmul.f32.gmra.mxu3 %v432_v25 }
  0xa9   : > { %587 = vmatmul.f32.gmra.mxu0 %v431_v24 }
  0xaa   : > { %700 = vmatmul.f32.gmra.mxu1 %v432_v25 }
  0xaf   : > { %816 = vmatmul.f32.gmra.mxu2 %v433_v26 }
  0xb0   : > { %929 = vmatmul.f32.gmra.mxu3 %v434_v27 }
  0xb1   : > { %590 = vmatmul.f32.gmra.mxu0 %v433_v26 }
  0xb2   : > { %703 = vmatmul.f32.gmra.mxu1 %v434_v27 }
  0xb7   : > { %819 = vmatmul.f32.gmra.mxu2 %v435_v28 }
  0xb8   : > { %932 = vmatmul.f32.gmra.mxu3 %v436_v29 }
  0xb9   : > { %593 = vmatmul.f32.gmra.mxu0 %v435_v28 }
  0xba   : > { %706 = vmatmul.f32.gmra.mxu1 %v436_v29 }
  0xbf   : > { %822 = vmatmul.f32.gmra.mxu2 %v437_v30 }
  0xc0   : > { %935 = vmatmul.f32.gmra.mxu3 %v438_v31 }
  0xc1   : > { %596 = vmatmul.f32.gmra.mxu0 %v437_v30  ;;  %v451_v30 = vld [vmem:[%s1871_s18 + $0x160] sm:$0xff] }
  0xc2   : > { %709 = vmatmul.f32.gmra.mxu1 %v438_v31  ;;  %v452_v31 = vld [vmem:[%s1871_s18 + $0x168] sm:$0xff] }
  0xc6   : > { %v552_v36 = vpop.f32.mrf.mxu0 }
  0xc7   : > { %825 = vmatmul.f32.gmra.mxu2 %v439_v32  ;;  %v665_v37 = vpop.f32.mrf.mxu1 }
  0xc8   : > { %938 = vmatmul.f32.gmra.mxu3 %v440_v33  ;;  %v666_v38 = vadd.f32 %v665_v37, %v552_v36 }
  0xc9   : > { %599 = vmatmul.f32.gmra.mxu0 %v439_v32 }
  0xca   : > { %v778_v40 = vpop.f32.mrf.mxu2  ;;  %v1188_v42 = vadd.f32 %v1915_v35, %v666_v38  ;;  %712 = vmatmul.f32.gmra.mxu1 %v440_v33 }
  0xcb   : > { %v891_v41 = vpop.f32.mrf.mxu3 }
  0xcc   : > { %v892_v43 = vadd.f32 %v891_v41, %v778_v40  ;;  %1252 = vst [vmem:[%s1924_s20] sm:$0xff] %v1188_v42  ;;  %v453_v42 = vld [vmem:[%s1871_s18 + $0x170] sm:$0xff] }
  0xce   : > { %v1189_v46 = vadd.f32 %v1917_v39, %v892_v43  ;;  %v555_v47 = vpop.f32.mrf.mxu0  ;;  %v454_v43 = vld [vmem:[%s1871_s18 + $0x178] sm:$0xff] }
  0xcf   : > { %828 = vmatmul.f32.gmra.mxu2 %v441_v44  ;;  %v668_v48 = vpop.f32.mrf.mxu1 }
  0xd0   : > { %1253 = vst [vmem:[%s1924_s20 + $0x8] sm:$0xff] %v1189_v46  ;;  %941 = vmatmul.f32.gmra.mxu3 %v442_v45  ;;  %v669_v49 = vadd.f32 %v668_v48, %v555_v47 }
  0xd1   : > { %602 = vmatmul.f32.gmra.mxu0 %v441_v44 }
  0xd2   : > { %v781_v50 = vpop.f32.mrf.mxu2  ;;  %v1190_v52 = vadd.f32 %v1915_v35, %v669_v49  ;;  %715 = vmatmul.f32.gmra.mxu1 %v442_v45 }
  0xd3   : > { %v894_v51 = vpop.f32.mrf.mxu3 }
  0xd4   : > { %v895_v53 = vadd.f32 %v894_v51, %v781_v50  ;;  %1254 = vst [vmem:[%s1924_s20 + $0x10] sm:$0xff] %v1190_v52  ;;  %v455_v52 = vld [vmem:[%s1871_s18 + $0x180] sm:$0xff] }
  0xd6   : > { %v1191_v56 = vadd.f32 %v1917_v39, %v895_v53  ;;  %v558_v57 = vpop.f32.mrf.mxu0  ;;  %v456_v53 = vld [vmem:[%s1871_s18 + $0x188] sm:$0xff] }
  0xd7   : > { %831 = vmatmul.f32.gmra.mxu2 %v443_v54  ;;  %v671_v58 = vpop.f32.mrf.mxu1 }
  0xd8   : > { %1255 = vst [vmem:[%s1924_s20 + $0x18] sm:$0xff] %v1191_v56  ;;  %944 = vmatmul.f32.gmra.mxu3 %v444_v55  ;;  %v672_v59 = vadd.f32 %v671_v58, %v558_v57 }
  0xd9   : > { %605 = vmatmul.f32.gmra.mxu0 %v443_v54 }
  0xda   : > { %v784_v60 = vpop.f32.mrf.mxu2  ;;  %v1192_v62 = vadd.f32 %v1915_v35, %v672_v59  ;;  %718 = vmatmul.f32.gmra.mxu1 %v444_v55 }
  0xdb   : > { %v897_v61 = vpop.f32.mrf.mxu3 }
  0xdc   : > { %v898_v63 = vadd.f32 %v897_v61, %v784_v60  ;;  %1256 = vst [vmem:[%s1924_s20 + $0x20] sm:$0xff] %v1192_v62  ;;  %v457_v62 = vld [vmem:[%s1871_s18 + $0x190] sm:$0xff] }
  0xde   : > { %v1193_v2 = vadd.f32 %v1917_v39, %v898_v63  ;;  %v561_v3 = vpop.f32.mrf.mxu0  ;;  %v458_v63 = vld [vmem:[%s1871_s18 + $0x198] sm:$0xff] }
  0xdf   : > { %834 = vmatmul.f32.gmra.mxu2 %v445_v0  ;;  %v674_v4 = vpop.f32.mrf.mxu1 }
  0xe0   : > { %1257 = vst [vmem:[%s1924_s20 + $0x28] sm:$0xff] %v1193_v2  ;;  %947 = vmatmul.f32.gmra.mxu3 %v446_v1  ;;  %v675_v5 = vadd.f32 %v674_v4, %v561_v3 }
  0xe1   : > { %608 = vmatmul.f32.gmra.mxu0 %v445_v0 }
  0xe2   : > { %v787_v6 = vpop.f32.mrf.mxu2  ;;  %v1194_v8 = vadd.f32 %v1915_v35, %v675_v5  ;;  %721 = vmatmul.f32.gmra.mxu1 %v446_v1 }
  0xe3   : > { %v900_v7 = vpop.f32.mrf.mxu3 }
  0xe4   : > { %v901_v9 = vadd.f32 %v900_v7, %v787_v6  ;;  %1258 = vst [vmem:[%s1924_s20 + $0x30] sm:$0xff] %v1194_v8  ;;  %v459_v8 = vld [vmem:[%s1871_s18 + $0x1a0] sm:$0xff] }
  0xe6   : > { %v1195_v12 = vadd.f32 %v1917_v39, %v901_v9  ;;  %v564_v13 = vpop.f32.mrf.mxu0  ;;  %v460_v9 = vld [vmem:[%s1871_s18 + $0x1a8] sm:$0xff] }
  0xe7   : > { %837 = vmatmul.f32.gmra.mxu2 %v447_v10  ;;  %v677_v14 = vpop.f32.mrf.mxu1 }
  0xe8   : > { %1259 = vst [vmem:[%s1924_s20 + $0x38] sm:$0xff] %v1195_v12  ;;  %950 = vmatmul.f32.gmra.mxu3 %v448_v11  ;;  %v678_v15 = vadd.f32 %v677_v14, %v564_v13 }
  0xe9   : > { %611 = vmatmul.f32.gmra.mxu0 %v447_v10 }
  0xea   : > { %v790_v16 = vpop.f32.mrf.mxu2  ;;  %v1196_v18 = vadd.f32 %v1915_v35, %v678_v15  ;;  %724 = vmatmul.f32.gmra.mxu1 %v448_v11 }
  0xeb   : > { %v903_v17 = vpop.f32.mrf.mxu3 }
  0xec   : > { %v904_v19 = vadd.f32 %v903_v17, %v790_v16  ;;  %1260 = vst [vmem:[%s1924_s20 + $0x40] sm:$0xff] %v1196_v18  ;;  %v461_v18 = vld [vmem:[%s1871_s18 + $0x1b0] sm:$0xff] }
  0xee   : > { %v1197_v22 = vadd.f32 %v1917_v39, %v904_v19  ;;  %v567_v23 = vpop.f32.mrf.mxu0  ;;  %v462_v19 = vld [vmem:[%s1871_s18 + $0x1b8] sm:$0xff] }
  0xef   : > { %840 = vmatmul.f32.gmra.mxu2 %v449_v20  ;;  %v680_v24 = vpop.f32.mrf.mxu1 }
  0xf0   : > { %1261 = vst [vmem:[%s1924_s20 + $0x48] sm:$0xff] %v1197_v22  ;;  %953 = vmatmul.f32.gmra.mxu3 %v450_v21  ;;  %v681_v25 = vadd.f32 %v680_v24, %v567_v23 }
  0xf1   : > { %614 = vmatmul.f32.gmra.mxu0 %v449_v20 }
  0xf2   : > { %v793_v26 = vpop.f32.mrf.mxu2  ;;  %v1198_v28 = vadd.f32 %v1915_v35, %v681_v25  ;;  %727 = vmatmul.f32.gmra.mxu1 %v450_v21 }
  0xf3   : > { %v906_v27 = vpop.f32.mrf.mxu3 }
  0xf4   : > { %v907_v29 = vadd.f32 %v906_v27, %v793_v26  ;;  %1262 = vst [vmem:[%s1924_s20 + $0x50] sm:$0xff] %v1198_v28  ;;  %v463_v28 = vld [vmem:[%s1871_s18 + $0x1c0] sm:$0xff] }
  0xf6   : > { %v1199_v32 = vadd.f32 %v1917_v39, %v907_v29  ;;  %v570_v33 = vpop.f32.mrf.mxu0  ;;  %v464_v29 = vld [vmem:[%s1871_s18 + $0x1c8] sm:$0xff] }
  0xf7   : > { %843 = vmatmul.f32.gmra.mxu2 %v451_v30  ;;  %v683_v34 = vpop.f32.mrf.mxu1 }
  0xf8   : > { %1263 = vst [vmem:[%s1924_s20 + $0x58] sm:$0xff] %v1199_v32  ;;  %956 = vmatmul.f32.gmra.mxu3 %v452_v31  ;;  %v684_v36 = vadd.f32 %v683_v34, %v570_v33 }
  0xf9   : > { %617 = vmatmul.f32.gmra.mxu0 %v451_v30 }
  0xfa   : > { %v796_v37 = vpop.f32.mrf.mxu2  ;;  %v1200_v40 = vadd.f32 %v1915_v35, %v684_v36  ;;  %730 = vmatmul.f32.gmra.mxu1 %v452_v31 }
  0xfb   : > { %v909_v38 = vpop.f32.mrf.mxu3 }
  0xfc   : > { %v910_v41 = vadd.f32 %v909_v38, %v796_v37  ;;  %1264 = vst [vmem:[%s1924_s20 + $0x60] sm:$0xff] %v1200_v40  ;;  %v465_v40 = vld [vmem:[%s1871_s18 + $0x1d0] sm:$0xff] }
  0xfe   : > { %v1201_v44 = vadd.f32 %v1917_v39, %v910_v41  ;;  %v573_v45 = vpop.f32.mrf.mxu0  ;;  %v466_v41 = vld [vmem:[%s1871_s18 + $0x1d8] sm:$0xff] }
  0xff   : > { %846 = vmatmul.f32.gmra.mxu2 %v453_v42  ;;  %v686_v46 = vpop.f32.mrf.mxu1 }
 0x100   : > { %1265 = vst [vmem:[%s1924_s20 + $0x68] sm:$0xff] %v1201_v44  ;;  %959 = vmatmul.f32.gmra.mxu3 %v454_v43  ;;  %v687_v47 = vadd.f32 %v686_v46, %v573_v45 }
 0x101   : > { %620 = vmatmul.f32.gmra.mxu0 %v453_v42 }
 0x102   : > { %v799_v48 = vpop.f32.mrf.mxu2  ;;  %v1202_v50 = vadd.f32 %v1915_v35, %v687_v47  ;;  %733 = vmatmul.f32.gmra.mxu1 %v454_v43 }
 0x103   : > { %v912_v49 = vpop.f32.mrf.mxu3 }
 0x104   : > { %v913_v51 = vadd.f32 %v912_v49, %v799_v48  ;;  %1266 = vst [vmem:[%s1924_s20 + $0x70] sm:$0xff] %v1202_v50  ;;  %v467_v50 = vld [vmem:[%s1871_s18 + $0x1e0] sm:$0xff] }
 0x106   : > { %v1203_v54 = vadd.f32 %v1917_v39, %v913_v51  ;;  %v576_v55 = vpop.f32.mrf.mxu0  ;;  %v468_v51 = vld [vmem:[%s1871_s18 + $0x1e8] sm:$0xff] }
 0x107   : > { %849 = vmatmul.f32.gmra.mxu2 %v455_v52  ;;  %v689_v56 = vpop.f32.mrf.mxu1 }
 0x108   : > { %1267 = vst [vmem:[%s1924_s20 + $0x78] sm:$0xff] %v1203_v54  ;;  %962 = vmatmul.f32.gmra.mxu3 %v456_v53  ;;  %v690_v57 = vadd.f32 %v689_v56, %v576_v55 }
 0x109   : > { %623 = vmatmul.f32.gmra.mxu0 %v455_v52 }
 0x10a   : > { %v802_v58 = vpop.f32.mrf.mxu2  ;;  %v1204_v60 = vadd.f32 %v1915_v35, %v690_v57  ;;  %736 = vmatmul.f32.gmra.mxu1 %v456_v53 }
 0x10b   : > { %v915_v59 = vpop.f32.mrf.mxu3 }
 0x10c   : > { %v916_v61 = vadd.f32 %v915_v59, %v802_v58  ;;  %1268 = vst [vmem:[%s1924_s20 + $0x80] sm:$0xff] %v1204_v60  ;;  %v469_v60 = vld [vmem:[%s1871_s18 + $0x1f0] sm:$0xff] }
 0x10e   : > { %v1205_v0 = vadd.f32 %v1917_v39, %v916_v61  ;;  %v579_v1 = vpop.f32.mrf.mxu0  ;;  %v470_v61 = vld [vmem:[%s1871_s18 + $0x1f8] sm:$0xff] }
 0x10f   : > { %852 = vmatmul.f32.gmra.mxu2 %v457_v62  ;;  %v692_v2 = vpop.f32.mrf.mxu1 }
 0x110   : > { %1269 = vst [vmem:[%s1924_s20 + $0x88] sm:$0xff] %v1205_v0  ;;  %965 = vmatmul.f32.gmra.mxu3 %v458_v63  ;;  %v693_v3 = vadd.f32 %v692_v2, %v579_v1 }
 0x111   : > { %626 = vmatmul.f32.gmra.mxu0 %v457_v62 }
 0x112   : > { %v805_v4 = vpop.f32.mrf.mxu2  ;;  %v1206_v6 = vadd.f32 %v1915_v35, %v693_v3  ;;  %739 = vmatmul.f32.gmra.mxu1 %v458_v63 }
 0x113   : > { %v918_v5 = vpop.f32.mrf.mxu3 }
 0x114   : > { %v919_v7 = vadd.f32 %v918_v5, %v805_v4  ;;  %1270 = vst [vmem:[%s1924_s20 + $0x90] sm:$0xff] %v1206_v6 }
 0x116   : > { %v1207_v10 = vadd.f32 %v1917_v39, %v919_v7  ;;  %v582_v11 = vpop.f32.mrf.mxu0 }
 0x117   : > { %855 = vmatmul.f32.gmra.mxu2 %v459_v8  ;;  %v695_v12 = vpop.f32.mrf.mxu1 }
 0x118   : > { %1271 = vst [vmem:[%s1924_s20 + $0x98] sm:$0xff] %v1207_v10  ;;  %968 = vmatmul.f32.gmra.mxu3 %v460_v9  ;;  %v696_v13 = vadd.f32 %v695_v12, %v582_v11 }
 0x119   : > { %629 = vmatmul.f32.gmra.mxu0 %v459_v8 }
 0x11a   : > { %v808_v14 = vpop.f32.mrf.mxu2  ;;  %v1208_v16 = vadd.f32 %v1915_v35, %v696_v13  ;;  %742 = vmatmul.f32.gmra.mxu1 %v460_v9 }
 0x11b   : > { %v921_v15 = vpop.f32.mrf.mxu3 }
 0x11c   : > { %v922_v17 = vadd.f32 %v921_v15, %v808_v14  ;;  %1272 = vst [vmem:[%s1924_s20 + $0xa0] sm:$0xff] %v1208_v16 }
 0x11e   : > { %v1209_v20 = vadd.f32 %v1917_v39, %v922_v17  ;;  %v585_v21 = vpop.f32.mrf.mxu0 }
 0x11f   : > { %858 = vmatmul.f32.gmra.mxu2 %v461_v18  ;;  %v698_v22 = vpop.f32.mrf.mxu1 }
 0x120   : > { %1273 = vst [vmem:[%s1924_s20 + $0xa8] sm:$0xff] %v1209_v20  ;;  %971 = vmatmul.f32.gmra.mxu3 %v462_v19  ;;  %v699_v23 = vadd.f32 %v698_v22, %v585_v21 }
 0x121   : > { %632 = vmatmul.f32.gmra.mxu0 %v461_v18 }
 0x122   : > { %v811_v24 = vpop.f32.mrf.mxu2  ;;  %v1210_v26 = vadd.f32 %v1915_v35, %v699_v23  ;;  %745 = vmatmul.f32.gmra.mxu1 %v462_v19 }
 0x123   : > { %v924_v25 = vpop.f32.mrf.mxu3 }
 0x124   : > { %v925_v27 = vadd.f32 %v924_v25, %v811_v24  ;;  %1274 = vst [vmem:[%s1924_s20 + $0xb0] sm:$0xff] %v1210_v26 }
 0x126   : > { %v1211_v30 = vadd.f32 %v1917_v39, %v925_v27  ;;  %v588_v31 = vpop.f32.mrf.mxu0 }
 0x127   : > { %861 = vmatmul.f32.gmra.mxu2 %v463_v28  ;;  %v701_v32 = vpop.f32.mrf.mxu1 }
 0x128   : > { %1275 = vst [vmem:[%s1924_s20 + $0xb8] sm:$0xff] %v1211_v30  ;;  %974 = vmatmul.f32.gmra.mxu3 %v464_v29  ;;  %v702_v33 = vadd.f32 %v701_v32, %v588_v31 }
 0x129   : > { %635 = vmatmul.f32.gmra.mxu0 %v463_v28 }
 0x12a   : > { %v814_v34 = vpop.f32.mrf.mxu2  ;;  %v1212_v37 = vadd.f32 %v1915_v35, %v702_v33  ;;  %748 = vmatmul.f32.gmra.mxu1 %v464_v29 }
 0x12b   : > { %v927_v36 = vpop.f32.mrf.mxu3 }
 0x12c   : > { %v928_v38 = vadd.f32 %v927_v36, %v814_v34  ;;  %1276 = vst [vmem:[%s1924_s20 + $0xc0] sm:$0xff] %v1212_v37 }
 0x12e   : > { %v1213_v42 = vadd.f32 %v1917_v39, %v928_v38  ;;  %v591_v43 = vpop.f32.mrf.mxu0 }
 0x12f   : > { %864 = vmatmul.f32.gmra.mxu2 %v465_v40  ;;  %v704_v44 = vpop.f32.mrf.mxu1 }
 0x130   : > { %1277 = vst [vmem:[%s1924_s20 + $0xc8] sm:$0xff] %v1213_v42  ;;  %977 = vmatmul.f32.gmra.mxu3 %v466_v41  ;;  %v705_v45 = vadd.f32 %v704_v44, %v591_v43 }
 0x131   : > { %638 = vmatmul.f32.gmra.mxu0 %v465_v40 }
 0x132   : > { %v817_v46 = vpop.f32.mrf.mxu2  ;;  %v1214_v48 = vadd.f32 %v1915_v35, %v705_v45  ;;  %751 = vmatmul.f32.gmra.mxu1 %v466_v41 }
 0x133   : > { %v930_v47 = vpop.f32.mrf.mxu3 }
 0x134   : > { %v931_v49 = vadd.f32 %v930_v47, %v817_v46  ;;  %1278 = vst [vmem:[%s1924_s20 + $0xd0] sm:$0xff] %v1214_v48 }
 0x136   : > { %v1215_v52 = vadd.f32 %v1917_v39, %v931_v49  ;;  %v594_v53 = vpop.f32.mrf.mxu0 }
 0x137   : > { %867 = vmatmul.f32.gmra.mxu2 %v467_v50  ;;  %v707_v54 = vpop.f32.mrf.mxu1 }
 0x138   : > { %1279 = vst [vmem:[%s1924_s20 + $0xd8] sm:$0xff] %v1215_v52  ;;  %980 = vmatmul.f32.gmra.mxu3 %v468_v51  ;;  %v708_v55 = vadd.f32 %v707_v54, %v594_v53 }
 0x139   : > { %641 = vmatmul.f32.gmra.mxu0 %v467_v50 }
 0x13a   : > { %v820_v56 = vpop.f32.mrf.mxu2  ;;  %v1216_v58 = vadd.f32 %v1915_v35, %v708_v55  ;;  %754 = vmatmul.f32.gmra.mxu1 %v468_v51 }
 0x13b   : > { %v933_v57 = vpop.f32.mrf.mxu3 }
 0x13c   : > { %v934_v59 = vadd.f32 %v933_v57, %v820_v56  ;;  %1280 = vst [vmem:[%s1924_s20 + $0xe0] sm:$0xff] %v1216_v58 }
 0x13e   : > { %v1217_v62 = vadd.f32 %v1917_v39, %v934_v59  ;;  %v597_v63 = vpop.f32.mrf.mxu0 }
 0x13f   : > { %870 = vmatmul.f32.gmra.mxu2 %v469_v60  ;;  %v710_v0 = vpop.f32.mrf.mxu1 }
 0x140   : > { %1281 = vst [vmem:[%s1924_s20 + $0xe8] sm:$0xff] %v1217_v62  ;;  %983 = vmatmul.f32.gmra.mxu3 %v470_v61  ;;  %v711_v1 = vadd.f32 %v710_v0, %v597_v63 }
 0x141   : > { %644 = vmatmul.f32.gmra.mxu0 %v469_v60 }
 0x142   : > { %v823_v2 = vpop.f32.mrf.mxu2  ;;  %v1218_v4 = vadd.f32 %v1915_v35, %v711_v1  ;;  %757 = vmatmul.f32.gmra.mxu1 %v470_v61 }
 0x143   : > { %v936_v3 = vpop.f32.mrf.mxu3 }
 0x144   : > { %v937_v5 = vadd.f32 %v936_v3, %v823_v2  ;;  %1282 = vst [vmem:[%s1924_s20 + $0xf0] sm:$0xff] %v1218_v4 }
 0x146   : > { %v1219_v6 = vadd.f32 %v1917_v39, %v937_v5  ;;  %v600_v7 = vpop.f32.mrf.mxu0 }
 0x147   : > { %v713_v8 = vpop.f32.mrf.mxu1 }
 0x148   : > { %1283 = vst [vmem:[%s1924_s20 + $0xf8] sm:$0xff] %v1219_v6  ;;  %v714_v9 = vadd.f32 %v713_v8, %v600_v7 }
 0x14a   : > { %v826_v10 = vpop.f32.mrf.mxu2  ;;  %v1220_v12 = vadd.f32 %v1915_v35, %v714_v9 }
 0x14b   : > { %v939_v11 = vpop.f32.mrf.mxu3 }
 0x14c   : > { %v940_v13 = vadd.f32 %v939_v11, %v826_v10  ;;  %1284 = vst [vmem:[%s1924_s20 + $0x100] sm:$0xff] %v1220_v12 }
 0x14e   : > { %v1221_v14 = vadd.f32 %v1917_v39, %v940_v13  ;;  %v603_v15 = vpop.f32.mrf.mxu0 }
 0x14f   : > { %v716_v16 = vpop.f32.mrf.mxu1 }
 0x150   : > { %1285 = vst [vmem:[%s1924_s20 + $0x108] sm:$0xff] %v1221_v14  ;;  %v717_v17 = vadd.f32 %v716_v16, %v603_v15 }
 0x152   : > { %v829_v18 = vpop.f32.mrf.mxu2  ;;  %v1222_v20 = vadd.f32 %v1915_v35, %v717_v17 }
 0x153   : > { %v942_v19 = vpop.f32.mrf.mxu3 }
 0x154   : > { %v943_v21 = vadd.f32 %v942_v19, %v829_v18  ;;  %1286 = vst [vmem:[%s1924_s20 + $0x110] sm:$0xff] %v1222_v20 }
 0x156   : > { %v1223_v22 = vadd.f32 %v1917_v39, %v943_v21  ;;  %v606_v23 = vpop.f32.mrf.mxu0 }
 0x157   : > { %v719_v24 = vpop.f32.mrf.mxu1 }
 0x158   : > { %1287 = vst [vmem:[%s1924_s20 + $0x118] sm:$0xff] %v1223_v22  ;;  %v720_v25 = vadd.f32 %v719_v24, %v606_v23 }
 0x15a   : > { %v832_v26 = vpop.f32.mrf.mxu2  ;;  %v1224_v28 = vadd.f32 %v1915_v35, %v720_v25 }
 0x15b   : > { %v945_v27 = vpop.f32.mrf.mxu3 }
 0x15c   : > { %v946_v29 = vadd.f32 %v945_v27, %v832_v26  ;;  %1288 = vst [vmem:[%s1924_s20 + $0x120] sm:$0xff] %v1224_v28 }
 0x15e   : > { %v1225_v30 = vadd.f32 %v1917_v39, %v946_v29  ;;  %v609_v31 = vpop.f32.mrf.mxu0 }
 0x15f   : > { %v722_v32 = vpop.f32.mrf.mxu1 }
 0x160   : > { %1289 = vst [vmem:[%s1924_s20 + $0x128] sm:$0xff] %v1225_v30  ;;  %v723_v33 = vadd.f32 %v722_v32, %v609_v31 }
 0x162   : > { %v835_v34 = vpop.f32.mrf.mxu2  ;;  %v1226_v37 = vadd.f32 %v1915_v35, %v723_v33 }
 0x163   : > { %v948_v36 = vpop.f32.mrf.mxu3 }
 0x164   : > { %v949_v38 = vadd.f32 %v948_v36, %v835_v34  ;;  %1290 = vst [vmem:[%s1924_s20 + $0x130] sm:$0xff] %v1226_v37 }
 0x166   : > { %v1227_v40 = vadd.f32 %v1917_v39, %v949_v38  ;;  %v612_v41 = vpop.f32.mrf.mxu0 }
 0x167   : > { %v725_v42 = vpop.f32.mrf.mxu1 }
 0x168   : > { %1291 = vst [vmem:[%s1924_s20 + $0x138] sm:$0xff] %v1227_v40  ;;  %v726_v43 = vadd.f32 %v725_v42, %v612_v41 }
 0x16a   : > { %v838_v44 = vpop.f32.mrf.mxu2  ;;  %v1228_v46 = vadd.f32 %v1915_v35, %v726_v43 }
 0x16b   : > { %v951_v45 = vpop.f32.mrf.mxu3 }
 0x16c   : > { %v952_v47 = vadd.f32 %v951_v45, %v838_v44  ;;  %1292 = vst [vmem:[%s1924_s20 + $0x140] sm:$0xff] %v1228_v46 }
 0x16e   : > { %v1229_v48 = vadd.f32 %v1917_v39, %v952_v47  ;;  %v615_v49 = vpop.f32.mrf.mxu0 }
 0x16f   : > { %v728_v50 = vpop.f32.mrf.mxu1 }
 0x170   : > { %1293 = vst [vmem:[%s1924_s20 + $0x148] sm:$0xff] %v1229_v48  ;;  %v729_v51 = vadd.f32 %v728_v50, %v615_v49 }
 0x172   : > { %v841_v52 = vpop.f32.mrf.mxu2  ;;  %v1230_v54 = vadd.f32 %v1915_v35, %v729_v51 }
 0x173   : > { %v954_v53 = vpop.f32.mrf.mxu3 }
 0x174   : > { %v955_v55 = vadd.f32 %v954_v53, %v841_v52  ;;  %1294 = vst [vmem:[%s1924_s20 + $0x150] sm:$0xff] %v1230_v54 }
 0x176   : > { %v1231_v56 = vadd.f32 %v1917_v39, %v955_v55  ;;  %v618_v57 = vpop.f32.mrf.mxu0 }
 0x177   : > { %v731_v58 = vpop.f32.mrf.mxu1 }
 0x178   : > { %1295 = vst [vmem:[%s1924_s20 + $0x158] sm:$0xff] %v1231_v56  ;;  %v732_v59 = vadd.f32 %v731_v58, %v618_v57 }
 0x17a   : > { %v844_v60 = vpop.f32.mrf.mxu2  ;;  %v1232_v62 = vadd.f32 %v1915_v35, %v732_v59 }
 0x17b   : > { %v957_v61 = vpop.f32.mrf.mxu3 }
 0x17c   : > { %v958_v63 = vadd.f32 %v957_v61, %v844_v60  ;;  %1296 = vst [vmem:[%s1924_s20 + $0x160] sm:$0xff] %v1232_v62 }
 0x17e   : > { %v1233_v0 = vadd.f32 %v1917_v39, %v958_v63  ;;  %v621_v1 = vpop.f32.mrf.mxu0 }
 0x17f   : > { %v734_v2 = vpop.f32.mrf.mxu1 }
 0x180   : > { %1297 = vst [vmem:[%s1924_s20 + $0x168] sm:$0xff] %v1233_v0  ;;  %v735_v3 = vadd.f32 %v734_v2, %v621_v1 }
 0x182   : > { %v847_v4 = vpop.f32.mrf.mxu2  ;;  %v1234_v6 = vadd.f32 %v1915_v35, %v735_v3 }
 0x183   : > { %v960_v5 = vpop.f32.mrf.mxu3 }
 0x184   : > { %v961_v7 = vadd.f32 %v960_v5, %v847_v4  ;;  %1298 = vst [vmem:[%s1924_s20 + $0x170] sm:$0xff] %v1234_v6 }
 0x186   : > { %v1235_v8 = vadd.f32 %v1917_v39, %v961_v7  ;;  %v624_v9 = vpop.f32.mrf.mxu0 }
 0x187   : > { %v737_v10 = vpop.f32.mrf.mxu1 }
 0x188   : > { %1299 = vst [vmem:[%s1924_s20 + $0x178] sm:$0xff] %v1235_v8  ;;  %v738_v11 = vadd.f32 %v737_v10, %v624_v9 }
 0x18a   : > { %v850_v12 = vpop.f32.mrf.mxu2  ;;  %v1236_v14 = vadd.f32 %v1915_v35, %v738_v11 }
 0x18b   : > { %v963_v13 = vpop.f32.mrf.mxu3 }
 0x18c   : > { %v964_v15 = vadd.f32 %v963_v13, %v850_v12  ;;  %1300 = vst [vmem:[%s1924_s20 + $0x180] sm:$0xff] %v1236_v14 }
 0x18e   : > { %v1237_v16 = vadd.f32 %v1917_v39, %v964_v15  ;;  %v627_v17 = vpop.f32.mrf.mxu0 }
 0x18f   : > { %v740_v18 = vpop.f32.mrf.mxu1 }
 0x190   : > { %1301 = vst [vmem:[%s1924_s20 + $0x188] sm:$0xff] %v1237_v16  ;;  %v741_v19 = vadd.f32 %v740_v18, %v627_v17 }
 0x192   : > { %v853_v20 = vpop.f32.mrf.mxu2  ;;  %v1238_v22 = vadd.f32 %v1915_v35, %v741_v19 }
 0x193   : > { %v966_v21 = vpop.f32.mrf.mxu3 }
 0x194   : > { %v967_v23 = vadd.f32 %v966_v21, %v853_v20  ;;  %1302 = vst [vmem:[%s1924_s20 + $0x190] sm:$0xff] %v1238_v22 }
 0x196   : > { %v1239_v24 = vadd.f32 %v1917_v39, %v967_v23  ;;  %v630_v25 = vpop.f32.mrf.mxu0 }
 0x197   : > { %v743_v26 = vpop.f32.mrf.mxu1 }
 0x198   : > { %1303 = vst [vmem:[%s1924_s20 + $0x198] sm:$0xff] %v1239_v24  ;;  %v744_v27 = vadd.f32 %v743_v26, %v630_v25 }
 0x19a   : > { %v856_v28 = vpop.f32.mrf.mxu2  ;;  %v1240_v30 = vadd.f32 %v1915_v35, %v744_v27 }
 0x19b   : > { %v969_v29 = vpop.f32.mrf.mxu3 }
 0x19c   : > { %v970_v31 = vadd.f32 %v969_v29, %v856_v28  ;;  %1304 = vst [vmem:[%s1924_s20 + $0x1a0] sm:$0xff] %v1240_v30 }
 0x19e   : > { %v1241_v32 = vadd.f32 %v1917_v39, %v970_v31  ;;  %v633_v33 = vpop.f32.mrf.mxu0 }
 0x19f   : > { %v746_v34 = vpop.f32.mrf.mxu1 }
 0x1a0   : > { %1305 = vst [vmem:[%s1924_s20 + $0x1a8] sm:$0xff] %v1241_v32  ;;  %v747_v36 = vadd.f32 %v746_v34, %v633_v33 }
 0x1a2   : > { %v859_v37 = vpop.f32.mrf.mxu2  ;;  %v1242_v40 = vadd.f32 %v1915_v35, %v747_v36 }
 0x1a3   : > { %v972_v38 = vpop.f32.mrf.mxu3 }
 0x1a4   : > { %v973_v41 = vadd.f32 %v972_v38, %v859_v37  ;;  %1306 = vst [vmem:[%s1924_s20 + $0x1b0] sm:$0xff] %v1242_v40 }
 0x1a6   : > { %v1243_v42 = vadd.f32 %v1917_v39, %v973_v41  ;;  %v636_v43 = vpop.f32.mrf.mxu0 }
 0x1a7   : > { %v749_v44 = vpop.f32.mrf.mxu1 }
 0x1a8   : > { %1307 = vst [vmem:[%s1924_s20 + $0x1b8] sm:$0xff] %v1243_v42  ;;  %v750_v45 = vadd.f32 %v749_v44, %v636_v43 }
 0x1aa   : > { %v862_v46 = vpop.f32.mrf.mxu2  ;;  %v1244_v48 = vadd.f32 %v1915_v35, %v750_v45 }
 0x1ab   : > { %v975_v47 = vpop.f32.mrf.mxu3 }
 0x1ac   : > { %v976_v49 = vadd.f32 %v975_v47, %v862_v46  ;;  %1308 = vst [vmem:[%s1924_s20 + $0x1c0] sm:$0xff] %v1244_v48 }
 0x1ae   : > { %v1245_v50 = vadd.f32 %v1917_v39, %v976_v49  ;;  %v639_v51 = vpop.f32.mrf.mxu0 }
 0x1af   : > { %v752_v52 = vpop.f32.mrf.mxu1 }
 0x1b0   : > { %1309 = vst [vmem:[%s1924_s20 + $0x1c8] sm:$0xff] %v1245_v50  ;;  %v753_v53 = vadd.f32 %v752_v52, %v639_v51 }
 0x1b2   : > { %v865_v54 = vpop.f32.mrf.mxu2  ;;  %v1246_v56 = vadd.f32 %v1915_v35, %v753_v53 }
 0x1b3   : > { %v978_v55 = vpop.f32.mrf.mxu3 }
 0x1b4   : > { %v979_v57 = vadd.f32 %v978_v55, %v865_v54  ;;  %1310 = vst [vmem:[%s1924_s20 + $0x1d0] sm:$0xff] %v1246_v56 }
 0x1b6   : > { %v1247_v58 = vadd.f32 %v1917_v39, %v979_v57  ;;  %v642_v59 = vpop.f32.mrf.mxu0 }
 0x1b7   : > { %v755_v60 = vpop.f32.mrf.mxu1 }
 0x1b8   : > { %1311 = vst [vmem:[%s1924_s20 + $0x1d8] sm:$0xff] %v1247_v58  ;;  %v756_v61 = vadd.f32 %v755_v60, %v642_v59 }
 0x1ba   : > { %v868_v62 = vpop.f32.mrf.mxu2  ;;  %v1248_v0 = vadd.f32 %v1915_v35, %v756_v61 }
 0x1bb   : > { %v981_v63 = vpop.f32.mrf.mxu3 }
 0x1bc   : > { %v982_v1 = vadd.f32 %v981_v63, %v868_v62  ;;  %1312 = vst [vmem:[%s1924_s20 + $0x1e0] sm:$0xff] %v1248_v0 }
 0x1be   : > { %v1249_v2 = vadd.f32 %v1917_v39, %v982_v1  ;;  %v645_v3 = vpop.f32.mrf.mxu0 }
 0x1bf   : > { %v758_v4 = vpop.f32.mrf.mxu1 }
 0x1c0   : > { %1313 = vst [vmem:[%s1924_s20 + $0x1e8] sm:$0xff] %v1249_v2  ;;  %v759_v5 = vadd.f32 %v758_v4, %v645_v3 }
 0x1c2   : > { %v871_v6 = vpop.f32.mrf.mxu2  ;;  %v1250_v8 = vadd.f32 %v1915_v35, %v759_v5 }
 0x1c3   : > { %v984_v7 = vpop.f32.mrf.mxu3 }
 0x1c4   : > { %v985_v9 = vadd.f32 %v984_v7, %v871_v6  ;;  %1314 = vst [vmem:[%s1924_s20 + $0x1f0] sm:$0xff] %v1250_v8 }
 0x1c6   : > { %v1251_v10 = vadd.f32 %v1917_v39, %v985_v9 }
 0x1c8   : > { %1315 = vst [vmem:[%s1924_s20 + $0x1f8] sm:$0xff] %v1251_v10 }
 0x1c9   : > { %1680 = shalt.err (!%p1677_p0)
}
 0x1ca   : > { %s1745_s10 = smov 256   ;;  %s1746_s24 = smov 16  }
 0x1cb   : > { %1486 = dma.vmem_to_hbm [thread:$0]  (%p1842_p2), %s1333_s23, 8192, %s1335_s27, %s1317_s15, %s1745_s10, %s1745_s10, %s1746_s24  }
 0x1cc PF: > { %s1349_s18 = sand.u32 1, %s1719_s12   ;;  %p1500_p4 = pnand %p1456_p10, %p1812_p5 }
 0x1cd   : > { %s1350_s20 = scalar_lea.sflag [#allocation5], %s1349_s18 }
 0x1ce   : > { %p1501_p6 = pneg %p1500_p4 }
 0x1d0   : > { %1714 = dma.done.wait (%p1501_p6), %s1350_s20, 8192  }
 0x1d1   : > { %1716 = vsyncadd (%p1501_p6), %s1350_s20, 4294959104  ;;  %s20_s17 = sadd.s32 1, %s1739_s17   ;;  %s2129_s12 = smov %s1723_s13 }
 0x1d2   : > { %p17_p8 = scmp.ge.s32.totalorder %s20_s17, 4   ;;  %s2130_s13 = smov %s1727_s14 }
 0x1d3   : > { %s2131_s14 = smov %s1852_s25  ;;  %s2132_s15 = smov %s1735_s16 }
 0x1d4   : > { %s2133_s16 = smov %s2135_s9  ;;  %19 = sbr.rel (!%p17_p8) target bundleno = 7 (0x7), region = 95 }
 0x1d9   :  { %1356 = vsyncpa [#allocation4], 1 }
 0x1da   :  { %1358 = vsyncpa [#allocation4 + $0x1], 1 }
 0x1db   :  { %1359 = vsyncpa [#allocation7], 1 }
 0x1dc   :  { %1360 = vsyncpa [#allocation5], 1 }
 0x1dd   :  { %1362 = vsyncpa [#allocation5 + $0x1], 1 }

</bundles_post_ra>
